<compile_context>
chip_gen: v7x
topology: tpu7x:2x2x1
jax: 0.10.0
libtpu: 0.0.40
codegen_flags: <defaults>
</compile_context>

<pallas_src>
import functools
import math

import jax
import jax.numpy as jnp
from jax import lax
from jax.experimental import pallas as pl
from jax.experimental.pallas import tpu as pltpu


def _round_up(v, m):
    return (v + m - 1) // m * m


_VMEM_LIMIT = 32 * 1024 * 1024  # fits v7x's 64 MiB VMEM with headroom


# ----------------------------------------------------------------------------
# Kernel 1: tiled matmul + bias + activation (every nn.Linear)
# ----------------------------------------------------------------------------
def _matmul_kernel(x_ref, w_ref, b_ref, o_ref, acc_ref, *, act):
    @pl.when(pl.program_id(2) == 0)
    def _():
        acc_ref[...] = jnp.zeros_like(acc_ref)

    acc_ref[...] += jnp.dot(x_ref[...], w_ref[...],
                            preferred_element_type=jnp.float32)

    @pl.when(pl.program_id(2) == pl.num_programs(2) - 1)
    def _():
        y = acc_ref[...] + b_ref[...]
        if act == "relu":
            y = jnp.maximum(y, 0.0)
        elif act == "sigmoid":
            y = jax.nn.sigmoid(y)
        o_ref[...] = y


def pallas_linear(x, w, b=None, act="none", tm=256, tn=256, tk=512):
    """act(x @ w + b), tiled over (M, N, K) with a VMEM f32 accumulator."""
    x = jnp.asarray(x, jnp.float32)
    w = jnp.asarray(w, jnp.float32)
    M, K = x.shape
    K2, N = w.shape
    assert K == K2, (x.shape, w.shape)
    if b is None:
        b = jnp.zeros((N,), jnp.float32)
    b = jnp.asarray(b, jnp.float32)

    bm = min(tm, _round_up(M, 8))
    bn = min(tn, _round_up(N, 128))     # lane-dense output stores
    bk = min(tk, _round_up(K, 128))
    Mp, Kp, Np = _round_up(M, bm), _round_up(K, bk), _round_up(N, bn)

    xp = jnp.pad(x, ((0, Mp - M), (0, Kp - K))) if (Mp != M or Kp != K) else x
    wp = jnp.pad(w, ((0, Kp - K), (0, Np - N))) if (Kp != K or Np != N) else w
    bp = (jnp.pad(b, (0, Np - N)) if Np != N else b).reshape(1, Np)

    grid = (Mp // bm, Np // bn, Kp // bk)
    out = pl.pallas_call(
        functools.partial(_matmul_kernel, act=act),
        out_shape=jax.ShapeDtypeStruct((Mp, Np), jnp.float32),
        grid=grid,
        in_specs=[pl.BlockSpec((bm, bk), lambda i, j, k: (i, k)),
                  pl.BlockSpec((bk, bn), lambda i, j, k: (k, j)),
                  pl.BlockSpec((1, bn), lambda i, j, k: (0, j))],
        out_specs=pl.BlockSpec((bm, bn), lambda i, j, k: (i, j)),
        scratch_shapes=[pltpu.VMEM((bm, bn), jnp.float32)],
        compiler_params=pltpu.CompilerParams(
            dimension_semantics=("parallel", "parallel", "arbitrary"),
            vmem_limit_bytes=_VMEM_LIMIT),
        cost_estimate=pl.CostEstimate(
            flops=2 * Mp * Np * Kp, transcendentals=0,
            bytes_accessed=4 * (Mp * Kp + Kp * Np + Mp * Np)),
    )(xp, wp, bp)
    if Mp != M or Np != N:
        out = out[:M, :N]
    return out


# ----------------------------------------------------------------------------
# Kernel 2: segment-sum / scatter-add with in-VMEM one-hot generation
# ----------------------------------------------------------------------------
def _scatter_add_kernel(seg_ref, val_ref, o_ref, acc_ref, *, bs):
    @pl.when(pl.program_id(1) == 0)
    def _():
        acc_ref[...] = jnp.zeros_like(acc_ref)

    s_base = pl.program_id(0) * bs
    be = seg_ref.shape[1]
    rows = s_base + lax.broadcasted_iota(jnp.int32, (bs, be), 0)
    onehot = (rows == seg_ref[...]).astype(jnp.float32)      # built in vregs
    acc_ref[...] += jnp.dot(onehot, val_ref[...],
                            preferred_element_type=jnp.float32)

    @pl.when(pl.program_id(1) == pl.num_programs(1) - 1)
    def _():
        o_ref[...] = acc_ref[...]


def pallas_scatter_add(seg_ids, values, num_segments, ts=256, te=256):
    """out[s] = sum_{e : seg_ids[e]==s} values[e]; no HBM one-hot."""
    values = jnp.asarray(values, jnp.float32)
    E, F = values.shape
    S = int(num_segments)

    bs = min(ts, _round_up(S, 8))
    be = min(te, _round_up(E, 128))
    bf = _round_up(F, 128)             # F kept whole per block (F <= 128 here)
    Sp, Ep = _round_up(S, bs), _round_up(E, be)

    seg = jnp.asarray(seg_ids, jnp.int32)
    if Ep != E:
        seg = jnp.pad(seg, (0, Ep - E), constant_values=Sp)   # never matches
    seg = seg.reshape(1, Ep)
    vals = values
    if Ep != E or bf != F:
        vals = jnp.pad(values, ((0, Ep - E), (0, bf - F)))

    out = pl.pallas_call(
        functools.partial(_scatter_add_kernel, bs=bs),
        out_shape=jax.ShapeDtypeStruct((Sp, bf), jnp.float32),
        grid=(Sp // bs, Ep // be),
        in_specs=[pl.BlockSpec((1, be), lambda s, e: (0, e)),
                  pl.BlockSpec((be, bf), lambda s, e: (e, 0))],
        out_specs=pl.BlockSpec((bs, bf), lambda s, e: (s, 0)),
        scratch_shapes=[pltpu.VMEM((bs, bf), jnp.float32)],
        compiler_params=pltpu.CompilerParams(
            dimension_semantics=("parallel", "arbitrary"),
            vmem_limit_bytes=_VMEM_LIMIT),
        cost_estimate=pl.CostEstimate(
            flops=2 * Sp * Ep * bf, transcendentals=0,
            bytes_accessed=4 * (Ep * bf + Sp * bf) + 4 * Ep),
    )(seg, vals)
    return out[:S, :F]


# ----------------------------------------------------------------------------
# Kernel 3: global-query multi-head attention pool (all heads per grid step)
# ----------------------------------------------------------------------------
def _att_pool_kernel(q_ref, k_ref, v_ref, bias_ref, o_ref):
    q = q_ref[0]            # (nh, 1, dh)   -- scale already folded into q
    k = k_ref[0]            # (nh, L, dh)
    v = v_ref[0]            # (nh, L, dh)
    s = jnp.einsum("hqd,hkd->hqk", q, k,
                   preferred_element_type=jnp.float32)        # (nh, 1, L)
    s = s + bias_ref[0]                                       # (1, L) bcast
    m = jnp.max(s, axis=-1, keepdims=True)
    e = jnp.exp(s - m)
    attn = e * pl.reciprocal(jnp.sum(e, axis=-1, keepdims=True), approx=True)
    o_ref[0] = jnp.einsum("hqk,hkd->hqd", attn, v,
                          preferred_element_type=jnp.float32)  # (nh, 1, dh)


def pallas_att_pool(qh, kh, vh, bias):
    """qh [B,nh,1,dh], kh/vh [B,nh,L,dh], bias [B,1,L] -> [B,nh,1,dh]."""
    B, nh, _, dh = qh.shape
    L = kh.shape[2]
    return pl.pallas_call(
        _att_pool_kernel,
        out_shape=jax.ShapeDtypeStruct((B, nh, 1, dh), jnp.float32),
        grid=(B,),
        in_specs=[pl.BlockSpec((1, nh, 1, dh), lambda b: (b, 0, 0, 0)),
                  pl.BlockSpec((1, nh, L, dh), lambda b: (b, 0, 0, 0)),
                  pl.BlockSpec((1, nh, L, dh), lambda b: (b, 0, 0, 0)),
                  pl.BlockSpec((1, 1, L), lambda b: (b, 0, 0))],
        out_specs=pl.BlockSpec((1, nh, 1, dh), lambda b: (b, 0, 0, 0)),
        compiler_params=pltpu.CompilerParams(
            dimension_semantics=("parallel",),
            vmem_limit_bytes=_VMEM_LIMIT),
    )(qh, kh, vh, bias)


# ----------------------------------------------------------------------------
# Graph helpers (segment reductions routed through the Pallas kernels)
# ----------------------------------------------------------------------------
def segment_softmax(alpha, seg_ids, num_segments):
    # per-segment max via jax.ops.segment_max (plain-JAX glue, O(E) memory)
    m = jax.ops.segment_max(alpha, seg_ids, num_segments=num_segments)
    m = jnp.where(jnp.isfinite(m), m, 0.0)
    ex = jnp.exp(alpha - m[seg_ids])
    denom = pallas_scatter_add(seg_ids, ex, num_segments)
    return ex / (denom[seg_ids] + 1e-16)


def graph_norm(x, batch, counts, p, eps=1e-5):
    B = counts.shape[0]
    mean = pallas_scatter_add(batch, x, B) / counts[:, None]
    out = x - mean[batch] * p["mean_scale"][None, :]
    var = pallas_scatter_add(batch, out * out, B) / counts[:, None]
    std = jnp.sqrt(var + eps)
    return p["weight"][None, :] * out / std[batch] + p["bias"][None, :]


def transformer_conv(p, x, src, dst, edge_feat, num_heads, out_ch):
    # PyG TransformerConv(H, H, heads, concat=False, edge_dim=H), beta=False.
    N = x.shape[0]
    HH = num_heads * out_ch
    # Fused q/k/v/skip projection (shared LHS -> one lane-dense matmul).
    wf = jnp.concatenate([p["wq"], p["wk"], p["wv"], p["wskip"]], axis=1)
    bf = jnp.concatenate([p["bq"], p["bk"], p["bv"], p["bskip"]])
    proj = pallas_linear(x, wf, bf)                               # [N, 3HH+H]
    q = proj[:, :HH].reshape(N, num_heads, out_ch)
    k = proj[:, HH:2 * HH].reshape(N, num_heads, out_ch)
    v = proj[:, 2 * HH:3 * HH].reshape(N, num_heads, out_ch)
    skip = proj[:, 3 * HH:]
    e = pallas_linear(edge_feat, p["we"]).reshape(-1, num_heads, out_ch)
    q_i = q[dst]
    k_j = k[src] + e
    alpha = jnp.sum(q_i * k_j, axis=-1) / math.sqrt(out_ch)       # [E, heads]
    alpha = segment_softmax(alpha, dst, N)
    msg = (v[src] + e) * alpha[:, :, None]                        # [E, heads, out]
    agg = pallas_scatter_add(dst, msg.reshape(-1, HH), N)
    agg = agg.reshape(N, num_heads, out_ch).mean(axis=1)          # concat=False
    return agg + skip


def gatv2_conv(p, x, src, dst, num_heads, out_ch, negative_slope=0.2):
    # PyG GATv2Conv(H, H, heads, concat=False); add_self_loops=True.
    N = x.shape[0]
    HH = num_heads * out_ch
    loop = jnp.arange(N, dtype=src.dtype)
    src_sl = jnp.concatenate([src, loop])
    dst_sl = jnp.concatenate([dst, loop])
    # Fused l/r projection.
    wf = jnp.concatenate([p["wl"], p["wr"]], axis=1)
    bf = jnp.concatenate([p["bl"], p["br"]])
    proj = pallas_linear(x, wf, bf)                               # [N, 2HH]
    xl = proj[:, :HH].reshape(N, num_heads, out_ch)
    xr = proj[:, HH:].reshape(N, num_heads, out_ch)
    e = xl[src_sl] + xr[dst_sl]
    e = jnp.where(e > 0, e, negative_slope * e)                   # LeakyReLU
    alpha = jnp.sum(e * p["att"][None, :, :], axis=-1)            # [E', heads]
    alpha = segment_softmax(alpha, dst_sl, N)
    msg = xl[src_sl] * alpha[:, :, None]
    agg = pallas_scatter_add(dst_sl, msg.reshape(-1, HH), N)
    agg = agg.reshape(N, num_heads, out_ch).mean(axis=1)
    return agg + p["bias"][None, :]


def aggregate_edge_features(p_gate, p_fuse, x, src, dst, edge_feat):
    N = x.shape[0]
    gate_in = jnp.concatenate([x[src], x[dst], edge_feat], axis=-1)
    h = pallas_linear(gate_in, p_gate["w1"], p_gate["b1"], act="relu")
    gates = pallas_linear(h, p_gate["w2"], p_gate["b2"], act="sigmoid")
    gated = gates * edge_feat
    # (scatter over src + scatter over dst) fused into one segment-sum call
    idx = jnp.concatenate([src, dst])
    vals = jnp.concatenate([gated, gated], axis=0)
    agg = pallas_scatter_add(idx, vals, N) * 0.5
    return pallas_linear(agg, p_fuse["w"], p_fuse["b"])


# ----------------------------------------------------------------------------
# Losses (glue: tiny, scalar)
# ----------------------------------------------------------------------------
def coral_loss(logits, levels):
    logsig = jax.nn.log_sigmoid(logits)
    term = logsig * levels + (logsig - logits) * (1.0 - levels)
    return jnp.mean(-jnp.sum(term, axis=1))


def weighted_kappa_loss(probs, y, num_classes, eps=1e-10):
    labels = jnp.arange(num_classes, dtype=jnp.float32)
    diff = labels[None, :] - labels[:, None]
    weights = diff ** 2
    weights = weights / weights.max()
    n = probs.shape[0]
    onehot = jax.nn.one_hot(y, num_classes, dtype=jnp.float32)
    y_pred = probs / (jnp.sum(probs, axis=1, keepdims=True) + eps)
    O = y_pred.T @ onehot
    hist_pred = jnp.sum(y_pred, axis=0)
    hist_true = jnp.sum(onehot, axis=0)
    E = jnp.outer(hist_pred, hist_true) / n
    wO = jnp.sum(weights * O)
    wE = jnp.sum(weights * E)
    kappa = 1.0 - wO / (wE + eps)
    return jnp.log(1.0 - kappa + eps)


# ----------------------------------------------------------------------------
# Parameters (deterministic synthetic init)
# ----------------------------------------------------------------------------
class KeyGen:
    def __init__(self, seed):
        self.key = jax.random.PRNGKey(seed)

    def __call__(self):
        self.key, sub = jax.random.split(self.key)
        return sub


def init_params(seed, input_dim, hidden, num_classes, num_relations,
                num_pos_tags, pos_emb_dim, conv_layers, num_heads):
    kg = KeyGen(seed)

    def w(shape, scale=0.1):
        return scale * jax.random.normal(kg(), shape, jnp.float32)

    H = hidden
    HH = H * num_heads
    p = {}
    p["pos_emb"] = w((num_pos_tags, pos_emb_dim))
    p["edge_emb"] = w((num_relations, H))
    p["edge_proj"] = dict(w1=w((H, H)), b1=w((H,)), w2=w((H, H)), b2=w((H,)))
    p["node_proj"] = dict(w1=w((input_dim + pos_emb_dim, H)), b1=w((H,)),
                          w2=w((H, H)), b2=w((H,)))
    p["edge_gate"] = dict(w1=w((3 * H, H)), b1=w((H,)), w2=w((H, H)), b2=w((H,)))
    # TODO(synk): reference declares edge_fuse_proj = Linear(2*hidden, hidden) but
    # feeds it a [N, hidden] tensor (shape bug in the PyTorch code); implemented
    # as Linear(hidden, hidden) so the forward pass is well defined.
    p["edge_fuse"] = dict(w=w((H, H)), b=w((H,)))
    convs = []
    for i in range(conv_layers):
        if i % 2 == 0:   # TransformerConv
            convs.append(dict(kind="transformer",
                              wq=w((H, HH)), bq=w((HH,)),
                              wk=w((H, HH)), bk=w((HH,)),
                              wv=w((H, HH)), bv=w((HH,)),
                              we=w((H, HH)),
                              wskip=w((H, H)), bskip=w((H,))))
        else:            # GATv2Conv
            convs.append(dict(kind="gatv2",
                              wl=w((H, HH)), bl=w((HH,)),
                              wr=w((H, HH)), br=w((HH,)),
                              att=w((num_heads, H)),
                              bias=w((H,))))
    p["convs"] = convs
    p["norms"] = [dict(weight=jnp.ones((H,), jnp.float32),
                       bias=jnp.zeros((H,), jnp.float32),
                       mean_scale=jnp.ones((H,), jnp.float32))
                  for _ in range(conv_layers)]
    p["global_query"] = jax.random.normal(kg(), (1, H), jnp.float32)
    p["att_pool"] = dict(wq=w((H, H)), bq=w((H,)),
                         wk=w((H, H)), bk=w((H,)),
                         wv=w((H, H)), bv=w((H,)),
                         wo=w((H, H)), bo=w((H,)))
    p["fc"] = dict(w=w((H, num_classes - 1)), b=w((num_classes - 1,)))
    p["fc_wkl"] = dict(w=w((H, num_classes)), b=w((num_classes,)))
    return p


# ----------------------------------------------------------------------------
# Forward pass
# ----------------------------------------------------------------------------
def stronger_edge_gnn_forward(params, data, cfg):
    H = cfg["hidden"]
    heads = cfg["num_heads"]
    C = cfg["num_classes"]
    graph_sizes = cfg["graph_sizes"]

    x_in = data["x"].astype(jnp.float32)
    y = data["y"]
    src, dst = data["edge_index"][0], data["edge_index"][1]
    edge_attr = data["edge_attr"].reshape(-1)
    batch = data["batch"]
    pos_tag_ids = data["pos_tag_ids"]
    B = len(graph_sizes)

    # POS-tag mean embedding (masked mean over tag positions)
    mask = (pos_tag_ids != 0)[..., None]
    pos_e = jnp.take(params["pos_emb"], pos_tag_ids, axis=0) * mask.astype(jnp.float32)
    denom = jnp.maximum(jnp.sum(mask, axis=1), 1).astype(jnp.float32)
    pos_features = jnp.sum(pos_e, axis=1) / denom

    # Edge features: embedding -> Linear/ReLU/Linear
    ef = jnp.take(params["edge_emb"], edge_attr, axis=0)
    ef = pallas_linear(ef, params["edge_proj"]["w1"], params["edge_proj"]["b1"], act="relu")
    edge_features = pallas_linear(ef, params["edge_proj"]["w2"], params["edge_proj"]["b2"])

    # Node projection
    x = jnp.concatenate([x_in, pos_features], axis=-1)
    x = pallas_linear(x, params["node_proj"]["w1"], params["node_proj"]["b1"], act="relu")
    x = pallas_linear(x, params["node_proj"]["w2"], params["node_proj"]["b2"], act="relu")

    counts = jnp.asarray(graph_sizes, jnp.float32)
    x_res = x
    x_prev = x
    for i in range(cfg["conv_layers"]):
        cp = params["convs"][i]
        if cp["kind"] == "transformer":
            x_new = transformer_conv(cp, x_prev, src, dst, edge_features, heads, H)
        else:
            x_new = gatv2_conv(cp, x_prev, src, dst, heads, H)
        x_new = graph_norm(x_new, batch, counts, params["norms"][i])
        x_new = jnp.maximum(x_new, 0.0)
        # dropout: eval mode (identity)
        x = x_prev + x_new + aggregate_edge_features(
            params["edge_gate"], params["edge_fuse"], x_new, src, dst, edge_features)
        x_prev = x
    x = x + x_res

    # Pad per-graph node lists with a single scatter (no per-graph update loop)
    L = max(graph_sizes)
    pos_in_graph = jnp.concatenate(
        [jnp.arange(sz, dtype=jnp.int32) for sz in graph_sizes])
    padded = jnp.zeros((B, L, H), jnp.float32).at[batch, pos_in_graph].set(x)
    valid = jnp.arange(L, dtype=jnp.int32)[None, :] < jnp.asarray(graph_sizes, jnp.int32)[:, None]

    # Attention pool with a learned global query (all heads per grid step)
    ap = params["att_pool"]
    nh_pool = 4
    dh = H // nh_pool
    scale = 1.0 / math.sqrt(dh)
    q_in = jnp.broadcast_to(params["global_query"], (B, H))
    qp = pallas_linear(q_in, ap["wq"] * scale, ap["bq"] * scale)        # scale folded
    wkv = jnp.concatenate([ap["wk"], ap["wv"]], axis=1)                  # fused K/V
    bkv = jnp.concatenate([ap["bk"], ap["bv"]])
    kv = pallas_linear(padded.reshape(B * L, H), wkv, bkv)               # [B*L, 2H]
    kp = kv[:, :H].reshape(B, L, H)
    vp = kv[:, H:].reshape(B, L, H)
    qh = qp.reshape(B, nh_pool, 1, dh)
    kh = kp.reshape(B, L, nh_pool, dh).transpose(0, 2, 1, 3)             # [B, nh, L, dh]
    vh = vp.reshape(B, L, nh_pool, dh).transpose(0, 2, 1, 3)
    bias = jnp.where(valid, 0.0, -1e30).astype(jnp.float32)[:, None, :]  # [B, 1, L]
    att = pallas_att_pool(qh, kh, vh, bias)                              # [B, nh, 1, dh]
    pooled = att.reshape(B, H)
    pooled = pallas_linear(pooled, ap["wo"], ap["bo"])

    # F.layer_norm without affine params
    mu = jnp.mean(pooled, axis=-1, keepdims=True)
    var = jnp.mean((pooled - mu) ** 2, axis=-1, keepdims=True)
    x_pool = (pooled - mu) / jnp.sqrt(var + 1e-5)

    # Fused fc / fc_wkl heads (shared LHS)
    w_heads = jnp.concatenate([params["fc"]["w"], params["fc_wkl"]["w"]], axis=1)
    b_heads = jnp.concatenate([params["fc"]["b"], params["fc_wkl"]["b"]])
    head_out = pallas_linear(x_pool, w_heads, b_heads)
    logits = head_out[:, :C - 1]
    logits_wkl = head_out[:, C - 1:]

    levels = (jnp.arange(C - 1)[None, :] < y[:, None]).astype(jnp.float32)
    loss_coral = coral_loss(logits, levels)
    probs = jax.nn.softmax(logits_wkl, axis=1)
    loss_wkl = weighted_kappa_loss(probs, y, C)

    loss = 0.2 * loss_coral + 0.8 * loss_wkl
    return {"loss": loss, "logits": logits}


# ----------------------------------------------------------------------------
# Example
# ----------------------------------------------------------------------------
if __name__ == "__main__":
    input_dim = 16
    hidden = 32
    num_classes = 4
    num_relations = 8
    num_pos_tags = 12
    pos_emb_dim = 16
    conv_layers = 4
    num_heads = 4
    T = 6                       # pos tags per node
    graph_sizes = [7, 5]        # two graphs, 12 nodes total
    N = sum(graph_sizes)

    cfg = dict(hidden=hidden, num_heads=num_heads, num_classes=num_classes,
               conv_layers=conv_layers, graph_sizes=graph_sizes)

    params = init_params(1, input_dim, hidden, num_classes, num_relations,
                         num_pos_tags, pos_emb_dim, conv_layers, num_heads)

    key = jax.random.PRNGKey(0)
    k_x, k_e0a, k_e0b, k_e1a, k_e1b, k_attr, k_pos = jax.random.split(key, 7)

    def rand_edges(ka, kb, n_edges, n_nodes, offset):
        s = jax.random.randint(ka, (n_edges,), 0, n_nodes)
        d = (s + jax.random.randint(kb, (n_edges,), 1, n_nodes)) % n_nodes
        return s + offset, d + offset

    s0, d0 = rand_edges(k_e0a, k_e0b, 12, graph_sizes[0], 0)
    s1, d1 = rand_edges(k_e1a, k_e1b, 8, graph_sizes[1], graph_sizes[0])
    edge_index = jnp.stack([jnp.concatenate([s0, s1]),
                            jnp.concatenate([d0, d1])]).astype(jnp.int32)
    E = edge_index.shape[1]

    data = dict(
        x=jax.random.normal(k_x, (N, input_dim), jnp.float32),
        pos_tag_ids=jax.random.randint(k_pos, (N, T), 0, num_pos_tags).astype(jnp.int32),
        edge_index=edge_index,
        edge_attr=jax.random.randint(k_attr, (E,), 0, num_relations).astype(jnp.int32),
        batch=jnp.asarray([0] * graph_sizes[0] + [1] * graph_sizes[1], jnp.int32),
        y=jnp.asarray([2, 1], jnp.int32),
    )

    out = stronger_edge_gnn_forward(params, data, cfg)
    jax.block_until_ready(out["loss"])
    jax.block_until_ready(out["logits"])
    print("KERNEL_OK")
</pallas_src>

<mosaic_0001>
module attributes {stable_mosaic.version = 11 : i64} {
  func.func @_matmul_kernel(%arg0: i32, %arg1: i32, %arg2: i32, %arg3: memref<24x128xf32, #tpu.memory_space<vmem>>, %arg4: memref<128x128xf32, #tpu.memory_space<vmem>>, %arg5: memref<1x128xf32, #tpu.memory_space<vmem>>, %arg6: memref<24x128xf32, #tpu.memory_space<vmem>>, %arg7: memref<24x128xf32, #tpu.memory_space<vmem>>) attributes {dimension_semantics = [#tpu.dimension_semantics<parallel>, #tpu.dimension_semantics<parallel>, #tpu.dimension_semantics<arbitrary>], iteration_bounds = array<i64: 1, 1, 1>, scalar_prefetch = 0 : i64, scratch_operands = 1 : i64, tpu.core_type = #tpu.core_type<tc>, window_params = [{transform_indices = @transform_0, window_bounds = array<i64: 24, 128>}, {transform_indices = @transform_1, window_bounds = array<i64: 128, 128>}, {transform_indices = @transform_2, window_bounds = array<i64: 1, 128>}, {transform_indices = @transform_3, window_bounds = array<i64: 24, 128>}]} {
    %c0_i32 = arith.constant 0 : i32
    %0 = arith.cmpi eq, %arg2, %c0_i32 : i32
    %1 = arith.extui %0 : i1 to i32
    %c0_i32_0 = arith.constant 0 : i32
    %2 = arith.cmpi ne, %1, %c0_i32_0 : i32
    scf.if %2 {
      %cst_10 = arith.constant 0.000000e+00 : f32
      %12 = vector.broadcast %cst_10 : f32 to vector<24x128xf32>
      %c0_11 = arith.constant 0 : index
      %c0_12 = arith.constant 0 : index
      %13 = vector.load %arg7[%c0_11, %c0_12] : memref<24x128xf32, #tpu.memory_space<vmem>>, vector<24x128xf32>
      tpu.vector_store %arg7[%c0_11, %c0_12], %12 {strides = array<i32>} : memref<24x128xf32, #tpu.memory_space<vmem>>, vector<24x128xf32>,
    } else {
    }
    %c0 = arith.constant 0 : index
    %c0_1 = arith.constant 0 : index
    %3 = vector.load %arg7[%c0, %c0_1] : memref<24x128xf32, #tpu.memory_space<vmem>>, vector<24x128xf32>
    %c0_2 = arith.constant 0 : index
    %c0_3 = arith.constant 0 : index
    %4 = vector.load %arg3[%c0_2, %c0_3] : memref<24x128xf32, #tpu.memory_space<vmem>>, vector<24x128xf32>
    %c0_4 = arith.constant 0 : index
    %c0_5 = arith.constant 0 : index
    %5 = vector.load %arg4[%c0_4, %c0_5] : memref<128x128xf32, #tpu.memory_space<vmem>>, vector<128x128xf32>
    %cst = arith.constant dense<0.000000e+00> : vector<24x128xf32>
    %6 = tpu.matmul %4, %5, %cst {dimension_numbers = #tpu.dot_dimension_numbers<[1], [0], [0], [1], [0, 0, 1, 1], [], []>} : vector<24x128xf32>, vector<128x128xf32>, vector<24x128xf32> -> vector<24x128xf32>
    %7 = arith.addf %3, %6 : vector<24x128xf32>
    %c0_6 = arith.constant 0 : index
    %c0_7 = arith.constant 0 : index
    %8 = vector.load %arg7[%c0_6, %c0_7] : memref<24x128xf32, #tpu.memory_space<vmem>>, vector<24x128xf32>
    tpu.vector_store %arg7[%c0_6, %c0_7], %7 {strides = array<i32>} : memref<24x128xf32, #tpu.memory_space<vmem>>, vector<24x128xf32>,
    %c0_i32_8 = arith.constant 0 : i32
    %9 = arith.cmpi eq, %arg2, %c0_i32_8 : i32
    %10 = arith.extui %9 : i1 to i32
    %c0_i32_9 = arith.constant 0 : i32
    %11 = arith.cmpi ne, %10, %c0_i32_9 : i32
    scf.if %11 {
      %c0_10 = arith.constant 0 : index
      %c0_11 = arith.constant 0 : index
      %12 = vector.load %arg7[%c0_10, %c0_11] : memref<24x128xf32, #tpu.memory_space<vmem>>, vector<24x128xf32>
      %c0_12 = arith.constant 0 : index
      %c0_13 = arith.constant 0 : index
      %13 = vector.load %arg5[%c0_12, %c0_13] : memref<1x128xf32, #tpu.memory_space<vmem>>, vector<1x128xf32>
      %14 = vector.broadcast %13 : vector<1x128xf32> to vector<24x128xf32>
      %15 = arith.addf %12, %14 : vector<24x128xf32>
      %cst_14 = arith.constant 0.000000e+00 : f32
      %16 = vector.broadcast %cst_14 : f32 to vector<24x128xf32>
      %17 = arith.maximumf %15, %16 : vector<24x128xf32>
      %c0_15 = arith.constant 0 : index
      %c0_16 = arith.constant 0 : index
      %18 = vector.load %arg6[%c0_15, %c0_16] : memref<24x128xf32, #tpu.memory_space<vmem>>, vector<24x128xf32>
      tpu.vector_store %arg6[%c0_15, %c0_16], %17 {strides = array<i32>} : memref<24x128xf32, #tpu.memory_space<vmem>>, vector<24x128xf32>,
    } else {
    }
    return
  }
  func.func @transform_0(%arg0: i32, %arg1: i32, %arg2: i32) -> (i32, i32) {
    %c0_i32 = arith.constant 0 : i32
    return %arg0, %arg2 : i32, i32
  }
  func.func @transform_1(%arg0: i32, %arg1: i32, %arg2: i32) -> (i32, i32) {
    %c0_i32 = arith.constant 0 : i32
    return %arg2, %arg1 : i32, i32
  }
  func.func @transform_2(%arg0: i32, %arg1: i32, %arg2: i32) -> (i32, i32) {
    %c0_i32 = arith.constant 0 : i32
    %c0_i32_0 = arith.constant 0 : i32
    return %c0_i32, %arg1 : i32, i32
  }
  func.func @transform_3(%arg0: i32, %arg1: i32, %arg2: i32) -> (i32, i32) {
    %c0_i32 = arith.constant 0 : i32
    return %arg0, %arg1 : i32, i32
  }
}

</mosaic_0001>

<bundles_post_ra>
// kernel: tpu_custom_call.1
= control target key start
LH: loop header
LB: loop body
LE: loop exit
PB: predicated region body
PF: predicated region fallthrough
CT: control target
= control target key end

     0   :  { %8 = vsyncpa [#allocation4], 0  ;;  %s458_s0 = inlined_call_operand.hbm [shape: f32[24,128], index: 0, kind: input, shape index: {}]   ;;  %s459_s1 = inlined_call_operand.hbm [shape: f32[128,128], index: 1, kind: input, shape index: {}]   ;;  %s460_s2 = inlined_call_operand.vmem [shape: f32[1,128], index: 2, kind: input, shape index: {}]   ;;  %s461_s3 = inlined_call_operand.hbm [shape: f32[24,128], index: 3, kind: output, shape index: {}]  }
   0x1   :  { %9 = vsyncpa [#allocation7], 0 }
   0x2   :  { %10 = vsyncpa [#allocation5], 0  ;;  %s379_s12 = smov [#allocation3]   ;;  %s307_s16 = scalar_lea.hbm %s458_s0, 384 }
   0x3   :  { %s16_s13 = sshll.u32 %s379_s12, 4  ;;  %p308_p0 = scmp.ne.s32.totalorder %s458_s0, %s307_s16  ;;  %s17_s13 = int_to_ptr.vmem [resolvable:$true] %s16_s13 }
   0x4   :  { %p311_p1 = scmp.lt.u32.totalorder %s307_s16, %s458_s0 }
   0x6   :  { %p313_p2 = pnand %p311_p1, %p308_p0 }
   0x8   :  { %316 = shalt.err (!%p313_p2)
}
   0x9   :  { %s317_s21 = scalar_lea.vmem %s17_s13, 384  ;;  %p322_p4 = scmp.lt.s32.totalorder %s17_s13, %s17_s13 }
   0xa   :  { %p318_p3 = scmp.ne.s32.totalorder %s17_s13, %s317_s21  ;;  %p323_p5 = scmp.lt.s32.totalorder %s317_s21, %s317_s21 }
   0xc   :  { %p324_p6 = por %p323_p5, %p322_p4 }
   0xe   :  { %p325_p7 = pnand %p324_p6, %p318_p3 }
  0x10   :  { %328 = shalt.err (!%p325_p7)
}
  0x11   :  { %s380_s22 = smov 128   ;;  %s381_s23 = smov 8  }
  0x12   :  { %22 = dma.hbm_to_vmem [thread:$0]  %s458_s0, 384, %s17_s13, [#allocation4], %s380_s22, %s380_s22, %s381_s23  }
  0x13   :  { %s382_s26 = smov [#allocation6]   ;;  %s329_s30 = scalar_lea.hbm %s459_s1, 2048 }
  0x14   :  { %s28_s27 = sshll.u32 %s382_s26, 4  ;;  %p330_p8 = scmp.ne.s32.totalorder %s459_s1, %s329_s30  ;;  %s29_s27 = int_to_ptr.vmem [resolvable:$true] %s28_s27 }
  0x15   :  { %p333_p9 = scmp.lt.u32.totalorder %s329_s30, %s459_s1 }
  0x17   :  { %p335_p10 = pnand %p333_p9, %p330_p8 }
  0x19   :  { %338 = shalt.err (!%p335_p10)
}
  0x1a   :  { %s339_s8 = scalar_lea.vmem %s29_s27, 2048  ;;  %p344_p12 = scmp.lt.s32.totalorder %s29_s27, %s29_s27 }
  0x1b   :  { %p340_p11 = scmp.ne.s32.totalorder %s29_s27, %s339_s8  ;;  %p345_p13 = scmp.lt.s32.totalorder %s339_s8, %s339_s8 }
  0x1d   :  { %p346_p0 = por %p345_p13, %p344_p12 }
  0x1f   :  { %p347_p1 = pnand %p346_p0, %p340_p11 }
  0x21   :  { %350 = shalt.err (!%p347_p1)
}
  0x22   :  { %34 = dma.hbm_to_vmem [thread:$0]  %s459_s1, 2048, %s29_s27, [#allocation7], %s380_s22, %s380_s22, %s381_s23  }
  0x23   :  { %373 = dma.done.wait [#allocation4], 384  }
  0x24   :  { %374 = vsyncadd [#allocation4], 4294966912 }
  0x25   :  { %375 = dma.done.wait [#allocation7], 2048  }
  0x26   :  { %376 = vsyncadd [#allocation7], 4294965248  ;;  %v383_v0 = vmov 0.0|0.0   ;;  %vm384_vm0 = vmmov 0   ;;  %v385_v1 = vmov 0.0   ;;  %v56_v2 = vld [vmem:[#allocation6] sm:$0xff] }
  0x27   :  { %283 = vmatprep.subr.bf16.mxu1 %v383_v0  ;;  %259 = vmatprep.subr.bf16.mxu0 %v383_v0  ;;  %v57_v3 = vld [vmem:[#allocation6 + $0x8] sm:$0xff]  ;;  %v58_v4 = vld [vmem:[#allocation6 + $0x10] sm:$0xff]  ;;  %v59_v6 = vld [vmem:[#allocation6 + $0x18] sm:$0xff]  ;;  %s386_s11 = smov [#allocation8]  }
  0x28   :  { %253 = vmatprep.mubr.msk.f32.mxu1 %vm384_vm0, %v385_v1  ;;  %250 = vmatprep.mubr.msk.f32.mxu0 %vm384_vm0, %v385_v1  ;;  %v260_v5 = vpack.c.bf16 %v57_v3, %v56_v2  ;;  %v263_v7 = vpack.c.bf16 %v59_v6, %v58_v4  ;;  %v60_v8 = vld [vmem:[#allocation6 + $0x20] sm:$0xff]  ;;  %v61_v9 = vld [vmem:[#allocation6 + $0x28] sm:$0xff]  ;;  %v62_v11 = vld [vmem:[#allocation6 + $0x30] sm:$0xff]  ;;  %s185_s12 = sshll.u32 %s386_s11, 4  ;;  %s186_s12 = int_to_ptr.vmem [resolvable:$true] %s185_s12 }
  0x29   :  { %v266_v10 = vpack.c.bf16 %v61_v9, %v60_v8  ;;  %v63_v12 = vld [vmem:[#allocation6 + $0x38] sm:$0xff]  ;;  %v64_v14 = vld [vmem:[#allocation6 + $0x40] sm:$0xff]  ;;  %v65_v15 = vld [vmem:[#allocation6 + $0x48] sm:$0xff]  ;;  %s351_s13 = scalar_lea.vmem %s186_s12, 384  ;;  %p356_p3 = scmp.lt.s32.totalorder %s186_s12, %s186_s12 }
  0x2a   :  { %291 = vmatpush3.bf16.msra.mxu1 %v260_v5  ;;  %261 = vmatpush3.bf16.msra.mxu0 %v260_v5  ;;  %v269_v13 = vpack.c.bf16 %v63_v12, %v62_v11  ;;  %v272_v16 = vpack.c.bf16 %v65_v15, %v64_v14  ;;  %v66_v17 = vld [vmem:[#allocation6 + $0x50] sm:$0xff]  ;;  %v67_v18 = vld [vmem:[#allocation6 + $0x58] sm:$0xff]  ;;  %v68_v20 = vld [vmem:[#allocation6 + $0x60] sm:$0xff]  ;;  %p352_p2 = scmp.ne.s32.totalorder %s186_s12, %s351_s13  ;;  %p357_p4 = scmp.lt.s32.totalorder %s351_s13, %s351_s13 }
  0x2b   :  { %284 = vmatprep.subr.bf16.mxu1 %v383_v0  ;;  %262 = vmatprep.subr.bf16.mxu0 %v383_v0  ;;  %v275_v19 = vpack.c.bf16 %v67_v18, %v66_v17  ;;  %v69_v21 = vld [vmem:[#allocation6 + $0x68] sm:$0xff]  ;;  %v70_v23 = vld [vmem:[#allocation6 + $0x70] sm:$0xff]  ;;  %v71_v24 = vld [vmem:[#allocation6 + $0x78] sm:$0xff] }
  0x2c   :  { %v278_v22 = vpack.c.bf16 %v69_v21, %v68_v20  ;;  %v281_v25 = vpack.c.bf16 %v71_v24, %v70_v23  ;;  %v54_v26 = vld [vmem:[#allocation3 + $0x8] sm:$0xff]  ;;  %v53_v27 = vld [vmem:[#allocation3] sm:$0xff]  ;;  %v55_v28 = vld [vmem:[#allocation3 + $0x10] sm:$0xff]  ;;  %p358_p5 = por %p357_p4, %p356_p3 }
  0x2d   :  { %v198_v29 = vld [vmem:[%s460_s2] ss:$0 sm:$0xff] }
  0x2e   :  { %292 = vmatpush3.bf16.msra.mxu1 %v263_v7  ;;  %264 = vmatpush3.bf16.msra.mxu0 %v263_v7  ;;  %p359_p6 = pnand %p358_p5, %p352_p2 }
  0x2f   :  { %285 = vmatprep.subr.bf16.mxu1 %v383_v0  ;;  %265 = vmatprep.subr.bf16.mxu0 %v383_v0 }
  0x32   :  { %293 = vmatpush3.bf16.msra.mxu1 %v266_v10  ;;  %267 = vmatpush3.bf16.msra.mxu0 %v266_v10 }
  0x33   :  { %286 = vmatprep.subr.bf16.mxu1 %v383_v0  ;;  %268 = vmatprep.subr.bf16.mxu0 %v383_v0 }
  0x36   :  { %294 = vmatpush3.bf16.msra.mxu1 %v269_v13  ;;  %270 = vmatpush3.bf16.msra.mxu0 %v269_v13 }
  0x37   :  { %287 = vmatprep.subr.bf16.mxu1 %v383_v0  ;;  %271 = vmatprep.subr.bf16.mxu0 %v383_v0 }
  0x3a   :  { %295 = vmatpush3.bf16.msra.mxu1 %v272_v16  ;;  %273 = vmatpush3.bf16.msra.mxu0 %v272_v16 }
  0x3b   :  { %288 = vmatprep.subr.bf16.mxu1 %v383_v0  ;;  %274 = vmatprep.subr.bf16.mxu0 %v383_v0 }
  0x3e   :  { %296 = vmatpush3.bf16.msra.mxu1 %v275_v19  ;;  %276 = vmatpush3.bf16.msra.mxu0 %v275_v19 }
  0x3f   :  { %289 = vmatprep.subr.bf16.mxu1 %v383_v0  ;;  %277 = vmatprep.subr.bf16.mxu0 %v383_v0 }
  0x42   :  { %297 = vmatpush3.bf16.msra.mxu1 %v278_v22  ;;  %279 = vmatpush3.bf16.msra.mxu0 %v278_v22 }
  0x43   :  { %290 = vmatprep.subr.bf16.mxu1 %v383_v0  ;;  %280 = vmatprep.subr.bf16.mxu0 %v383_v0 }
  0x46   :  { %298 = vmatpush3.bf16.msra.mxu1 %v281_v25  ;;  %282 = vmatpush3.bf16.msra.mxu0 %v281_v25 }
  0x49   :  { %254 = vmatmul.mubr.f32.vlgmr.msra.gmra.mrb[0].mxu1 %v54_v26  ;;  %251 = vmatmul.mubr.f32.vlgmr.msra.gmra.mrb[0].mxu0 %v53_v27 }
  0x4a   :  { %256 = vmatprep.mubr.msk.f32.mxu1 %vm384_vm0, %v385_v1 }
  0x4d   :  { %257 = vmatmul.mubr.f32.gmra.mrb[2].mxu1 %v55_v28 }
 0x11c   :  { %v143_v30 = vpop.f32.mrb[0].mxu1  ;;  %v138_v31 = vpop.f32.mrb[0].mxu0 }
 0x11d   :  { %v172_v32 = vadd.f32 %v198_v29, %v143_v30  ;;  %v255_v33 = vpop.f32.mrb[1].mxu1  ;;  %v171_v34 = vadd.f32 %v198_v29, %v138_v31  ;;  %v252_v35 = vpop.f32.mrb[1].mxu0 }
 0x11f   :  { %v175_v36 = vmax.f32 %v172_v32, 0.0  ;;  %v174_v37 = vmax.f32 %v171_v34, 0.0 }
 0x120   :  { %v148_v38 = vpop.f32.mrb[2].mxu1 }
 0x121   :  { %178 = vst [vmem:[#allocation8 + $0x8] sm:$0xff] %v175_v36  ;;  %177 = vst [vmem:[#allocation8] sm:$0xff] %v174_v37  ;;  %v173_v39 = vadd.f32 %v198_v29, %v148_v38  ;;  %v258_v40 = vpop.f32.mrb[3].mxu1 }
 0x123   :  { %v176_v41 = vmax.f32 %v173_v39, 0.0 }
 0x125   :  { %179 = vst [vmem:[#allocation8 + $0x10] sm:$0xff] %v176_v41 }
 0x126   :  { %362 = shalt.err (!%p359_p6)
}
 0x127   :  { %s363_s15 = scalar_lea.hbm %s461_s3, 384 }
 0x128   :  { %p364_p7 = scmp.ne.s32.totalorder %s461_s3, %s363_s15  ;;  %p367_p8 = scmp.lt.u32.totalorder %s363_s15, %s461_s3 }
 0x12a   :  { %p369_p9 = pnand %p367_p8, %p364_p7 }
 0x12c   :  { %372 = shalt.err (!%p369_p9)
}
 0x12d   :  { %191 = dma.vmem_to_hbm [thread:$0]  %s186_s12, 384, %s461_s3, [#allocation5], %s380_s22, %s380_s22, %s381_s23  }
 0x12e   :  { %377 = dma.done.wait [#allocation5], 384  }
 0x12f   :  { %378 = vsyncadd [#allocation5], 4294966912 }
 0x130   :  { %195 = vsyncpa [#allocation4], 1 }
 0x131   :  { %196 = vsyncpa [#allocation7], 1 }
 0x132   :  { %197 = vsyncpa [#allocation5], 1 }

</bundles_post_ra>
